<compile_context>
chip_gen: v5e
topology: v5e:2x2
jax: 0.10.0
libtpu: 0.0.40
codegen_flags: <defaults>
</compile_context>

<pallas_src>
import functools

import jax
import jax.numpy as jnp
from jax.experimental import pallas as pl
from jax.experimental.pallas import tpu as pltpu


def _yolo_decode_kernel(x_ref, o_ref, *, H, W, n_ch, scale_x_y, anchors,
                        channel_minor):
    """Decode one (batch, anchor) tile.

    x_ref : VMEM (n_ch, H*W)  raw network output for one anchor (native dtype)
    o_ref : VMEM (n_ch, H*W)            channel-major output    (channel_minor=False)
            VMEM (H*W, n_ch_pad)        lane-dense channel-minor (channel_minor=True)
    anchors : static flat tuple (aw0, ah0, aw1, ah1, ...), already / stride
    """
    HW = H * W
    A = len(anchors) // 2

    inv_w = 1.0 / float(W)
    inv_h = 1.0 / float(H)
    scale = float(scale_x_y)
    off = 0.5 * (scale - 1.0)

    # --- per-anchor constants selected by grid position (scalar unit) -------
    a_idx = pl.program_id(1)
    aw = jnp.float32(anchors[0])
    ah = jnp.float32(anchors[1])
    for a in range(1, A):
        aw = jnp.where(a_idx == a, jnp.float32(anchors[2 * a]), aw)
        ah = jnp.where(a_idx == a, jnp.float32(anchors[2 * a + 1]), ah)

    # --- spatial grid along the lane axis, derived in float (no int div/mod).
    # Exact as long as HW stays far below f32's exact-integer range (asserted
    # in the wrapper); boundary margin 0.5/W >> f32 rounding error here.
    sp = jax.lax.broadcasted_iota(jnp.int32, (1, HW), 1).astype(jnp.float32)
    gy = jnp.floor((sp + 0.5) * inv_w)
    gx = sp - gy * float(W)

    # --- load + transcendentals ---------------------------------------------
    x = x_ref[...].astype(jnp.float32)          # (n_ch, HW), one dense load
    sig = jax.nn.sigmoid(x)                     # needed for x/y/det/cls rows

    n_head = min(n_ch, 8)                       # sublane tile holding rows 0..3
    ex_head = jnp.exp(x[:n_head]) * scale - off  # exp only on the w/h sublane tile

    # --- decode the "head" rows (x, y, w, h, det[, first cls...]) -----------
    ch = jax.lax.broadcasted_iota(jnp.int32, (n_head, 1), 0)
    is_wh = (ch >= 2) & (ch < 4)
    add = jnp.where(ch == 0, gx, jnp.where(ch == 1, gy, 0.0))      # (n_head, HW)
    mul = jnp.where(ch == 0, inv_w,
          jnp.where(ch == 1, inv_h,
          jnp.where(ch == 2, aw * inv_w,
          jnp.where(ch == 3, ah * inv_h, 1.0))))                   # (n_head, 1)
    head = (jnp.where(is_wh, ex_head, sig[:n_head]) + add) * mul   # (n_head, HW)
    # rows >= n_head (remaining class confidences) are plain sigmoid.

    if not channel_minor:
        # Lane-dense channel-major stores; layout change happens outside.
        if n_ch <= n_head:
            o_ref[...] = head.astype(o_ref.dtype)
        else:
            o_ref[pl.ds(0, n_head), :] = head.astype(o_ref.dtype)
            o_ref[pl.ds(n_head, n_ch - n_head), :] = sig[n_head:].astype(o_ref.dtype)
    else:
        # Zero-pad channels to a lane multiple (plain concat, no MXU), then one
        # on-chip transpose -> fully lane-dense (HW, n_ch_pad) store.
        n_ch_pad = ((n_ch + 127) // 128) * 128
        pieces = [head]
        if n_ch > n_head:
            pieces.append(sig[n_head:])
        if n_ch_pad > n_ch:
            pieces.append(jnp.zeros((n_ch_pad - n_ch, HW), jnp.float32))
        dec = pieces[0] if len(pieces) == 1 else jnp.concatenate(pieces, axis=0)
        # TODO(synk): for HW not a multiple of 128 (19x19 / 38x38 heads) the
        # transpose relies on Mosaic implicit lane padding of the source tile.
        o_ref[...] = dec.T.astype(o_ref.dtype)


def yolo_decode_pallas(x_nchw, masked_anchors, num_classes, scale_x_y):
    """x_nchw: (B, A*n_ch, H, W); masked_anchors: flat python list of 2*A floats."""
    B, C, H, W = x_nchw.shape
    n_ch = 5 + num_classes
    A = C // n_ch
    HW = H * W
    assert A * n_ch == C
    assert HW < (1 << 22), "float-iota grid derivation assumes HW << 2^24"

    # Free view only — no wrapper-side cast or copy; kernel reads native dtype.
    x = x_nchw.reshape(B, A, n_ch, HW)
    anchors = tuple(float(v) for v in masked_anchors)  # compile-time constants
    # Wide heads: pay ~128/n_ch write inflation for unmasked lane-dense stores.
    # Narrow heads: channel-major store + one XLA transpose pass is cheaper.
    channel_minor = n_ch >= 48

    kernel = functools.partial(
        _yolo_decode_kernel, H=H, W=W, n_ch=n_ch,
        scale_x_y=float(scale_x_y), anchors=anchors,
        channel_minor=channel_minor)

    cparams = pltpu.CompilerParams(
        dimension_semantics=("parallel", "parallel"),
        vmem_limit_bytes=32 * 1024 * 1024)

    in_spec = pl.BlockSpec((None, None, n_ch, HW), lambda b, a: (b, a, 0, 0))

    if channel_minor:
        n_ch_pad = ((n_ch + 127) // 128) * 128
        out = pl.pallas_call(
            kernel,
            out_shape=jax.ShapeDtypeStruct((B, A, HW, n_ch_pad), x_nchw.dtype),
            grid=(B, A),
            in_specs=[in_spec],
            out_specs=pl.BlockSpec((None, None, HW, n_ch_pad),
                                   lambda b, a: (b, a, 0, 0)),
            compiler_params=cparams,
        )(x)
        return out[..., :n_ch].reshape(B, A * HW, n_ch)
    else:
        out = pl.pallas_call(
            kernel,
            out_shape=jax.ShapeDtypeStruct((B, A, n_ch, HW), x_nchw.dtype),
            grid=(B, A),
            in_specs=[in_spec],
            out_specs=pl.BlockSpec((None, None, n_ch, HW),
                                   lambda b, a: (b, a, 0, 0)),
            compiler_params=cparams,
        )(x)
        # channel-major -> channel-minor outside the kernel: one cheap XLA pass
        # over a few-MB tensor, instead of ~18x masked in-kernel stores.
        return jnp.transpose(out, (0, 1, 3, 2)).reshape(B, A * HW, n_ch)


class YoloLayerJax:
    """JAX/Pallas mirror of the PyTorch YoloLayer (inference path only)."""

    def __init__(self, img_size, anchor_masks, num_classes, anchors,
                 num_anchors, scale_x_y=1.0):
        self.anchor_masks = anchor_masks
        self.num_classes = num_classes
        self.anchors = list(anchors)
        self.num_anchors = num_anchors
        self.anchor_step = len(self.anchors) // num_anchors
        self.scale_x_y = scale_x_y
        self.feature_length = [img_size[0] // 8, img_size[0] // 16,
                               img_size[0] // 32]
        self.img_size = img_size

    def __call__(self, output):
        in_w = output.shape[3]
        anchor_index = self.anchor_masks[self.feature_length.index(in_w)]
        stride_w = self.img_size[0] / in_w
        masked = []
        for m in anchor_index:
            masked += self.anchors[m * self.anchor_step:(m + 1) * self.anchor_step]
        # Anchors are baked as compile-time constants; a new anchor set /
        # stride triggers a (cheap) recompile.
        masked = [a / stride_w for a in masked]
        return yolo_decode_pallas(output, masked, self.num_classes, self.scale_x_y)


def _reference_decode(x, num_classes, masked_anchors_flat, A, scale):
    """Pure-JAX port of the PyTorch yolo_decode for verification."""
    B, C, H, W = x.shape
    n_ch = 5 + num_classes
    out = x.reshape(B, A, n_ch, H, W).transpose(0, 1, 3, 4, 2)
    bx = jax.nn.sigmoid(out[..., 0])
    by = jax.nn.sigmoid(out[..., 1])
    bw = jnp.exp(out[..., 2]) * scale - 0.5 * (scale - 1)
    bh = jnp.exp(out[..., 3]) * scale - 0.5 * (scale - 1)
    det = jax.nn.sigmoid(out[..., 4])
    cls = jax.nn.sigmoid(out[..., 5:])
    gx = jnp.arange(W, dtype=jnp.float32)[None, None, None, :]
    gy = jnp.arange(H, dtype=jnp.float32)[None, None, :, None]
    bx = bx + gx
    by = by + gy
    aw = jnp.array(masked_anchors_flat[0::2], jnp.float32).reshape(1, A, 1, 1)
    ah = jnp.array(masked_anchors_flat[1::2], jnp.float32).reshape(1, A, 1, 1)
    bw = bw * aw
    bh = bh * ah
    boxes = jnp.stack([bx / W, by / H, bw / W, bh / H], axis=-1)
    boxes = boxes.reshape(B, A * H * W, 4)
    det = det.reshape(B, A * H * W, 1)
    cls = cls.reshape(B, A * H * W, num_classes)
    return jnp.concatenate([boxes, det, cls], axis=-1)


if __name__ == "__main__":
    img_size = (128, 128)
    anchor_masks = [[0, 1, 2], [3, 4, 5], [6, 7, 8]]
    anchors = [12, 16, 19, 36, 40, 28, 36, 75, 76, 55,
               72, 146, 142, 110, 192, 243, 459, 401]
    num_anchors = 9
    scale_x_y = 1.05
    A, H, W = 3, 16, 16

    key = jax.random.PRNGKey(0)
    k1, k2 = jax.random.split(key)

    stride_w = img_size[0] / W
    masked_flat = [anchors[m * 2 + k] / stride_w
                   for m in anchor_masks[0] for k in (0, 1)]

    # --- test 1: narrow head (n_ch=7) -> channel-major store + XLA transpose.
    num_classes = 2
    B = 2
    n_ch = 5 + num_classes
    x1 = jax.random.normal(k1, (B, A * n_ch, H, W), dtype=jnp.float32)
    layer1 = YoloLayerJax(img_size, anchor_masks, num_classes, anchors,
                          num_anchors, scale_x_y)
    out1 = jax.block_until_ready(layer1(x1))
    ref1 = _reference_decode(x1, num_classes, masked_flat, A, scale_x_y)
    assert out1.shape == (B, A * H * W, n_ch)
    assert jnp.allclose(out1, ref1, atol=1e-4, rtol=1e-5)

    # --- test 2: wide head (n_ch=85, COCO-like) -> lane-padded channel-minor.
    num_classes2 = 80
    B2 = 1
    n_ch2 = 5 + num_classes2
    x2 = jax.random.normal(k2, (B2, A * n_ch2, H, W), dtype=jnp.float32)
    layer2 = YoloLayerJax(img_size, anchor_masks, num_classes2, anchors,
                          num_anchors, scale_x_y)
    out2 = jax.block_until_ready(layer2(x2))
    ref2 = _reference_decode(x2, num_classes2, masked_flat, A, scale_x_y)
    assert out2.shape == (B2, A * H * W, n_ch2)
    assert jnp.allclose(out2, ref2, atol=1e-4, rtol=1e-5)

    print("KERNEL_OK")
</pallas_src>

<mosaic_0001>
module attributes {stable_mosaic.version = 11 : i64} {
  func.func @_yolo_decode_kernel(%arg0: i32, %arg1: i32, %arg2: memref<1x1x7x256xf32, #tpu.memory_space<vmem>>, %arg3: memref<1x1x7x256xf32, #tpu.memory_space<vmem>>) attributes {dimension_semantics = [#tpu.dimension_semantics<parallel>, #tpu.dimension_semantics<parallel>], iteration_bounds = array<i64: 2, 3>, scalar_prefetch = 0 : i64, scratch_operands = 0 : i64, tpu.core_type = #tpu.core_type<tc>, window_params = [{transform_indices = @transform_0, window_bounds = array<i64: 1, 1, 7, 256>}, {transform_indices = @transform_1, window_bounds = array<i64: 1, 1, 7, 256>}]} {
    %c1_i32 = arith.constant 1 : i32
    %0 = arith.cmpi eq, %arg1, %c1_i32 : i32
    %cst = arith.constant 2.375000e+00 : f32
    %cst_0 = arith.constant 1.500000e+00 : f32
    %1 = arith.select %0, %cst, %cst_0 : f32
    %c1_i32_1 = arith.constant 1 : i32
    %2 = arith.cmpi eq, %arg1, %c1_i32_1 : i32
    %cst_2 = arith.constant 4.500000e+00 : f32
    %cst_3 = arith.constant 2.000000e+00 : f32
    %3 = arith.select %2, %cst_2, %cst_3 : f32
    %c2_i32 = arith.constant 2 : i32
    %4 = arith.cmpi eq, %arg1, %c2_i32 : i32
    %cst_4 = arith.constant 5.000000e+00 : f32
    %5 = arith.select %4, %cst_4, %1 : f32
    %c2_i32_5 = arith.constant 2 : i32
    %6 = arith.cmpi eq, %arg1, %c2_i32_5 : i32
    %cst_6 = arith.constant 3.500000e+00 : f32
    %7 = arith.select %6, %cst_6, %3 : f32
    %8 = tpu.iota {dimensions = array<i32: 1>} : vector<1x256xi32>
    %9 = arith.sitofp %8 : vector<1x256xi32> to vector<1x256xf32>
    %cst_7 = arith.constant 5.000000e-01 : f32
    %10 = vector.broadcast %cst_7 : f32 to vector<1x256xf32>
    %11 = arith.addf %9, %10 : vector<1x256xf32>
    %cst_8 = arith.constant 6.250000e-02 : f32
    %12 = vector.broadcast %cst_8 : f32 to vector<1x256xf32>
    %13 = arith.mulf %11, %12 : vector<1x256xf32>
    %14 = math.floor %13 : vector<1x256xf32>
    %cst_9 = arith.constant 1.600000e+01 : f32
    %15 = vector.broadcast %cst_9 : f32 to vector<1x256xf32>
    %16 = arith.mulf %14, %15 : vector<1x256xf32>
    %17 = arith.subf %9, %16 : vector<1x256xf32>
    %c0 = arith.constant 0 : index
    %c0_10 = arith.constant 0 : index
    %c0_11 = arith.constant 0 : index
    %c0_12 = arith.constant 0 : index
    %18 = vector.load %arg2[%c0, %c0_10, %c0_11, %c0_12] : memref<1x1x7x256xf32, #tpu.memory_space<vmem>>, vector<1x1x7x256xf32>
    %19 = vector.shape_cast %18 : vector<1x1x7x256xf32> to vector<7x256xf32>
    %20 = arith.negf %19 : vector<7x256xf32>
    %21 = math.exp %20 : vector<7x256xf32>
    %cst_13 = arith.constant 1.000000e+00 : f32
    %22 = vector.broadcast %cst_13 : f32 to vector<7x256xf32>
    %23 = arith.addf %22, %21 : vector<7x256xf32>
    %24 = arith.divf %22, %23 : vector<7x256xf32>
    %25 = math.exp %19 : vector<7x256xf32>
    %cst_14 = arith.constant 1.050000e+00 : f32
    %26 = vector.broadcast %cst_14 : f32 to vector<7x256xf32>
    %27 = arith.mulf %25, %26 : vector<7x256xf32>
    %cst_15 = arith.constant 2.500000e-02 : f32
    %28 = vector.broadcast %cst_15 : f32 to vector<7x256xf32>
    %29 = arith.subf %27, %28 : vector<7x256xf32>
    %30 = tpu.iota {dimensions = array<i32: 0>} : vector<7x1xi32>
    %c2_i32_16 = arith.constant 2 : i32
    %31 = vector.broadcast %c2_i32_16 : i32 to vector<7x1xi32>
    %32 = arith.cmpi sge, %30, %31 : vector<7x1xi32>
    %c4_i32 = arith.constant 4 : i32
    %33 = vector.broadcast %c4_i32 : i32 to vector<7x1xi32>
    %34 = arith.cmpi slt, %30, %33 : vector<7x1xi32>
    %35 = arith.andi %32, %34 : vector<7x1xi1>
    %c0_i32 = arith.constant 0 : i32
    %36 = vector.broadcast %c0_i32 : i32 to vector<7x1xi32>
    %37 = arith.cmpi eq, %30, %36 : vector<7x1xi32>
    %c1_i32_17 = arith.constant 1 : i32
    %38 = vector.broadcast %c1_i32_17 : i32 to vector<7x1xi32>
    %39 = arith.cmpi eq, %30, %38 : vector<7x1xi32>
    %cst_18 = arith.constant 0.000000e+00 : f32
    %40 = vector.shape_cast %39 : vector<7x1xi1> to vector<7x1xi1>
    %41 = vector.broadcast %40 : vector<7x1xi1> to vector<7x256xi1>
    %42 = vector.shape_cast %14 : vector<1x256xf32> to vector<1x256xf32>
    %43 = vector.broadcast %42 : vector<1x256xf32> to vector<7x256xf32>
    %44 = vector.broadcast %cst_18 : f32 to vector<7x256xf32>
    %45 = arith.select %41, %43, %44 : vector<7x256xi1>, vector<7x256xf32>
    %46 = vector.shape_cast %37 : vector<7x1xi1> to vector<7x1xi1>
    %47 = vector.broadcast %46 : vector<7x1xi1> to vector<7x256xi1>
    %48 = vector.shape_cast %17 : vector<1x256xf32> to vector<1x256xf32>
    %49 = vector.broadcast %48 : vector<1x256xf32> to vector<7x256xf32>
    %50 = arith.select %47, %49, %45 : vector<7x256xi1>, vector<7x256xf32>
    %c0_i32_19 = arith.constant 0 : i32
    %51 = vector.broadcast %c0_i32_19 : i32 to vector<7x1xi32>
    %52 = arith.cmpi eq, %30, %51 : vector<7x1xi32>
    %c1_i32_20 = arith.constant 1 : i32
    %53 = vector.broadcast %c1_i32_20 : i32 to vector<7x1xi32>
    %54 = arith.cmpi eq, %30, %53 : vector<7x1xi32>
    %c2_i32_21 = arith.constant 2 : i32
    %55 = vector.broadcast %c2_i32_21 : i32 to vector<7x1xi32>
    %56 = arith.cmpi eq, %30, %55 : vector<7x1xi32>
    %cst_22 = arith.constant 6.250000e-02 : f32
    %57 = arith.mulf %5, %cst_22 : f32
    %c3_i32 = arith.constant 3 : i32
    %58 = vector.broadcast %c3_i32 : i32 to vector<7x1xi32>
    %59 = arith.cmpi eq, %30, %58 : vector<7x1xi32>
    %cst_23 = arith.constant 6.250000e-02 : f32
    %60 = arith.mulf %7, %cst_23 : f32
    %cst_24 = arith.constant 1.000000e+00 : f32
    %61 = vector.broadcast %60 : f32 to vector<7x1xf32>
    %62 = vector.broadcast %cst_24 : f32 to vector<7x1xf32>
    %63 = arith.select %59, %61, %62 : vector<7x1xi1>, vector<7x1xf32>
    %64 = vector.broadcast %57 : f32 to vector<7x1xf32>
    %65 = arith.select %56, %64, %63 : vector<7x1xi1>, vector<7x1xf32>
    %cst_25 = arith.constant 6.250000e-02 : f32
    %66 = vector.broadcast %cst_25 : f32 to vector<7x1xf32>
    %67 = arith.select %54, %66, %65 : vector<7x1xi1>, vector<7x1xf32>
    %cst_26 = arith.constant 6.250000e-02 : f32
    %68 = vector.broadcast %cst_26 : f32 to vector<7x1xf32>
    %69 = arith.select %52, %68, %67 : vector<7x1xi1>, vector<7x1xf32>
    %70 = vector.shape_cast %35 : vector<7x1xi1> to vector<7x1xi1>
    %71 = vector.broadcast %70 : vector<7x1xi1> to vector<7x256xi1>
    %72 = arith.select %71, %29, %24 : vector<7x256xi1>, vector<7x256xf32>
    %73 = arith.addf %72, %50 : vector<7x256xf32>
    %74 = vector.broadcast %69 : vector<7x1xf32> to vector<7x256xf32>
    %75 = arith.mulf %73, %74 : vector<7x256xf32>
    %c0_27 = arith.constant 0 : index
    %c0_28 = arith.constant 0 : index
    %c0_29 = arith.constant 0 : index
    %c0_30 = arith.constant 0 : index
    %76 = vector.load %arg3[%c0_27, %c0_28, %c0_29, %c0_30] : memref<1x1x7x256xf32, #tpu.memory_space<vmem>>, vector<1x1x7x256xf32>
    %77 = vector.shape_cast %76 : vector<1x1x7x256xf32> to vector<7x256xf32>
    %78 = vector.shape_cast %75 : vector<7x256xf32> to vector<1x1x7x256xf32>
    tpu.vector_store %arg3[%c0_27, %c0_28, %c0_29, %c0_30], %78 {strides = array<i32>} : memref<1x1x7x256xf32, #tpu.memory_space<vmem>>, vector<1x1x7x256xf32>,
    return
  }
  func.func @transform_0(%arg0: i32, %arg1: i32) -> (i32, i32, i32, i32) {
    %c0_i32 = arith.constant 0 : i32
    %c0_i32_0 = arith.constant 0 : i32
    %c0_i32_1 = arith.constant 0 : i32
    return %arg0, %arg1, %c0_i32, %c0_i32_0 : i32, i32, i32, i32
  }
  func.func @transform_1(%arg0: i32, %arg1: i32) -> (i32, i32, i32, i32) {
    %c0_i32 = arith.constant 0 : i32
    %c0_i32_0 = arith.constant 0 : i32
    %c0_i32_1 = arith.constant 0 : i32
    return %arg0, %arg1, %c0_i32, %c0_i32_0 : i32, i32, i32, i32
  }
}

</mosaic_0001>

<bundles_post_ra>
// kernel: tpu_custom_call.1
= control target key start
LH: loop header
LB: loop body
LE: loop exit
PB: predicated region body
PF: predicated region fallthrough
CT: control target
= control target key end

     0   :  { %s470_s6 = smov 0   ;;  %s472_s7 = smov 0   ;;  %s558_s0 = inlined_call_operand.vmem [shape: f32[2,3,7,256], index: 0, kind: input, shape index: {}]   ;;  %s559_s1 = inlined_call_operand.vmem [shape: f32[2,3,7,256], index: 1, kind: output, shape index: {}]  }
   0x1   :  { %s474_s8 = smov 0   ;;  %s476_s9 = smov 0  }
   0x2   :  { %s478_s10 = smov 0  }
   0x3 LB: > { %s20_s11 = sadd.s32 1, %s450_s8  ;;  %s23_s12 = sadd.s32 1, %s454_s9  ;;  %s458_s10 = sphi %s478_s10, %s11_s10   ;;  %s454_s9 = sphi %s476_s9, %s565_s9   ;;  %s450_s8 = sphi %s474_s8, %s564_s8   ;;  %s446_s7 = sphi %s472_s7, %s563_s7   ;;  %s442_s6 = sphi %s470_s6, %s562_s6  }
   0x4   : > { %p21_p0 = scmp.ge.s32.totalorder %s20_s11, 3  ;;  %p356_p1 = scmp.ge.s32.totalorder %s458_s10, 1 }
   0x5   : > { %p107_p2 = scmp.lt.s32.totalorder %s458_s10, 7 }
   0x6   : > { %s567_s11 = smov (%p21_p0, %s20_s11), 0  ;;  %s569_s12 = smov (!%p21_p0, %s23_s12), %s454_s9 }
   0x7   : > { %p108_p3 = pnand %p356_p1, %p107_p2  ;;  %p25_p4 = scmp.ge.s32.totalorder %s569_s12, 2 }
   0x8   : > { %p135_p5 = scmp.lt.s32.totalorder (!%p108_p3), %s446_s7, 1  ;;  %p137_p6 = scmp.lt.s32.totalorder (!%p108_p3), %s442_s6, 2 }
   0x9   : > { %s571_s12 = smov (%p25_p4, %s569_s12), 0  ;;  %111 = sbr.rel (%p108_p3) target bundleno = 57 (0x39), region = 24 }
   0xa   : > { %p153_p7 = scmp.eq.s32.totalorder (!%p108_p3), %s442_s6, 1  ;;  %p156_p8 = scmp.eq.s32.totalorder (!%p108_p3), %s442_s6, 2 }
   0xe   : > { %v159_v0 = vlaneseq  ;;  %s573_s7 = smov (!%p135_p5, %s446_s7), 1 }
   0xf   : > { %s138_s13 = scalar_select %p137_p6, %s442_s6, 2 }
  0x10   : > { %s367_s14 = smul.u32 6, %s573_s7  ;;  %v504_v1 = vand.u32 127, %v159_v0  ;;  %v223_v19 = vshrl.u32 %v159_v0, 7 }
  0x11   : > { %s357_s15 = sshll.u32 %s138_s13, 1 }
  0x12   : > { %s506_s16 = sadd.s32 %s367_s14, %s357_s15  ;;  %v515_v2 = vadd.s32 128, %v504_v1  ;;  %v162_v7 = vcvt.s32.f32 %v504_v1  ;;  %vm239_vm0 = vcmp.eq.s32.totalorder %v223_v19, 3  ;;  %vm224_vm1 = vcmp.ge.s32.totalorder %v223_v19, 2 }
  0x13   : > { %s358_s17 = sshll.u32 %s506_s16, 3  ;;  %vm225_vm2 = vcmp.lt.s32.totalorder %v223_v19, 4  ;;  %vm227_vm3 = vcmp.eq.s32.totalorder %v223_v19, 0  ;;  %vm228_vm4 = vcmp.eq.s32.totalorder %v223_v19, 1  ;;  %vm237_vm5 = vcmp.eq.s32.totalorder %v223_v19, 2 }
  0x14   : > { %s143_s20 = scalar_lea.vmem %s558_s0, %s358_s17  ;;  %v163_v8 = vcvt.s32.f32 %v515_v2  ;;  %v164_v9 = vadd.f32 0.5, %v162_v7  ;;  %vm226_vm13 = vmand %vm224_vm1, %vm225_vm2  ;;  %s152_s27 = scalar_lea.vmem %s559_s1, %s358_s17 }
  0x15   : > { %v174_v3 = vld [vmem:[%s143_s20] sm:$0x7f]  ;;  %v175_v4 = vld [vmem:[%s143_s20 + $0x8] sm:$0x7f]  ;;  %s155_s21 = scalar_select %p153_p7, 4.5, 2.0 }
  0x16   : > { %v361_v5 = vmul.f32 -1.442695, %v174_v3  ;;  %v362_v6 = vmul.f32 -1.442695, %v175_v4  ;;  %s154_s22 = scalar_select %p153_p7, 2.375, 1.5 }
  0x17   : > { %v214_v10 = vmul.f32 1.442695, %v174_v3  ;;  %v216_v11 = vmul.f32 1.442695, %v175_v4  ;;  %v165_v12 = vadd.f32 0.5, %v163_v8  ;;  %s575_s21 = smov (%p156_p8, %s155_s21), 3.5 }
  0x18   : > { %408 = vpow2.f32 %v361_v5  ;;  %s577_s22 = smov (%p156_p8, %s154_s22), 5.0  ;;  %v166_v15 = vmul.f32 0.0625, %v164_v9  ;;  %s240_s23 = smul.f32 0.0625, %s575_s21 }
  0x19   : > { %410 = vpow2.f32 %v362_v6  ;;  %v167_v18 = vmul.f32 0.0625, %v165_v12  ;;  %s238_s24 = smul.f32 0.0625, %s577_s22 }
  0x1a   : > { %412 = vpow2.f32 %v214_v10  ;;  %v168_v20 = vfloor.f32 %v166_v15  ;;  %v241_v23 = vstv %s240_s23 }
  0x1b   : > { %414 = vpow2.f32 %v216_v11  ;;  %v169_v21 = vfloor.f32 %v167_v18  ;;  %v243_v27 = vstv %s238_s24  ;;  %v242_v30 = vsel %vm239_vm0, %v241_v23, 1.0 }
  0x1c   : > { %v170_v26 = vmul.f32 16.0, %v168_v20  ;;  %v231_v43 = vsel %vm228_vm4, %v168_v20, 0.0  ;;  %v244_v44 = vsel %vm237_vm5, %v243_v27, %v242_v30 }
  0x1d   : > { %v171_v31 = vmul.f32 16.0, %v169_v21  ;;  %v232_v49 = vsel %vm228_vm4, %v169_v21, 0.0  ;;  %v245_v54 = vsel %vm228_vm4, 0.0625, %v244_v44 }
  0x1e   : > { %v409_v13 = vpop.eup %408  ;;  %v172_v41 = vsub.f32 %v162_v7, %v170_v26  ;;  %v246_v61 = vsel %vm227_vm3, 0.0625, %v245_v54 }
  0x1f   : > { %v411_v14 = vpop.eup %410  ;;  %v182_v16 = vadd.f32 1.0, %v409_v13  ;;  %v173_v47 = vsub.f32 %v163_v8, %v171_v31 }
  0x20   : > { %v183_v17 = vadd.f32 1.0, %v411_v14  ;;  %v413_v22 = vpop.eup %412  ;;  %v235_v57 = vsel %vm227_vm3, %v172_v41, %v231_v43 }
  0x21   : > { %416 = vrcp.f32 %v182_v16  ;;  %v415_v24 = vpop.eup %414  ;;  %vm189_vm6 = vweird.f32 %v182_v16  ;;  %v193_v32 = vand.u32 2147483647, %v182_v16  ;;  %v195_v33 = vand.u32 2147483648, %v182_v16 }
  0x22   : > { %418 = vrcp.f32 %v183_v17  ;;  %v218_v34 = vmul.f32 1.05, %v413_v22  ;;  %v219_v37 = vmul.f32 1.05, %v415_v24  ;;  %v210_v38 = vand.u32 2147483648, %v183_v17 }
  0x23   : > { %vm204_vm8 = vweird.f32 %v183_v17  ;;  %v208_v40 = vand.u32 2147483647, %v183_v17  ;;  %v196_v46 = vor.u32 1.1754944e-38, %v195_v33  ;;  %vm194_vm11 = vcmp.eq.f32.partialorder %v193_v32, 8.507059e+37 }
  0x24   : > { %v363_v51 = vadd.f32 -0.025, %v218_v34  ;;  %v211_v52 = vor.u32 1.1754944e-38, %v210_v38  ;;  %v364_v53 = vadd.f32 -0.025, %v219_v37  ;;  %v236_v60 = vsel %vm227_vm3, %v173_v47, %v232_v49 }
  0x25   : > { %vm209_vm14 = vcmp.eq.f32.partialorder %v208_v40, 8.507059e+37 }
  0x27   : > { %v417_v25 = vpop.eup %416 }
  0x28   : > { %v419_v28 = vpop.eup %418  ;;  %v185_v29 = vmul.f32 %v417_v25, %v182_v16  ;;  %vm190_vm7 = vweird.f32 %v417_v25 }
  0x29   : > { %v200_v35 = vmul.f32 %v419_v28, %v183_v17  ;;  %vm205_vm9 = vweird.f32 %v419_v28  ;;  %vm524_vm10 = vmor %vm189_vm6, %vm190_vm7 }
  0x2a   : > { %v186_v36 = vsub.f32 1.0, %v185_v29  ;;  %vm206_vm12 = vmor %vm204_vm8, %vm205_vm9 }
  0x2b   : > { %v201_v39 = vsub.f32 1.0, %v200_v35 }
  0x2c   : > { %v187_v42 = vmul.f32 %v417_v25, %v186_v36 }
  0x2d   : > { %v202_v48 = vmul.f32 %v419_v28, %v201_v39 }
  0x2e   : > { %v188_v50 = vadd.f32 %v417_v25, %v187_v42 }
  0x2f   : > { %v203_v55 = vadd.f32 %v419_v28, %v202_v48 }
  0x30   : > { %v192_v56 = vsel %vm524_vm10, %v417_v25, %v188_v50 }
  0x31   : > { %v197_v58 = vsel %vm194_vm11, %v196_v46, %v192_v56  ;;  %v207_v59 = vsel %vm206_vm12, %v419_v28, %v203_v55 }
  0x32   : > { %v249_v62 = vsel %vm226_vm13, %v363_v51, %v197_v58  ;;  %v212_v63 = vsel %vm209_vm14, %v211_v52, %v207_v59 }
  0x33   : > { %v251_v0 = vadd.f32 %v249_v62, %v235_v57  ;;  %v250_v1 = vsel %vm226_vm13, %v364_v53, %v212_v63 }
  0x34   : > { %v252_v2 = vadd.f32 %v250_v1, %v236_v60 }
  0x35   : > { %v253_v3 = vmul.f32 %v251_v0, %v246_v61 }
  0x36   : > { %v254_v4 = vmul.f32 %v252_v2, %v246_v61 }
  0x37   : > { %255 = vst [vmem:[%s152_s27] sm:$0x7f] %v253_v3 }
  0x38   : > { %256 = vst [vmem:[%s152_s27 + $0x8] sm:$0x7f] %v254_v4 }
  0x39 PF: > { %s11_s10 = sadd.s32 1, %s458_s10   ;;  %s562_s6 = smov %s450_s8 }
  0x3a   : > { %p8_p9 = scmp.ge.s32.totalorder %s11_s10, 8   ;;  %s563_s7 = smov %s454_s9 }
  0x3b   : > { %s564_s8 = smov %s567_s11  ;;  %s565_s9 = smov %s571_s12 }
  0x3c   :  { %10 = sbr.rel (!%p8_p9) target bundleno = 3 (0x3), region = 54 }

</bundles_post_ra>
